<compile_context>
chip_gen: v6e
topology: v6e:2x2x1
jax: 0.10.0
libtpu: 0.0.40
codegen_flags: <defaults>
</compile_context>

<pallas_src>
import numpy as np
import jax
import jax.numpy as jnp
from jax.experimental import pallas as pl
from jax.experimental.pallas import tpu as pltpu


def get_sobel_kernel_np(k=3):
    # Same as the PyTorch module's get_sobel_kernel (used only by the reference).
    rng = np.linspace(-(k // 2), k // 2, k)
    x, y = np.meshgrid(rng, rng)
    num = x
    den = x ** 2 + y ** 2
    den[:, k // 2] = 1
    return (num / den).astype(np.float32)


# Baked-in constants (== get_sobel_kernel_np(3)):
#   sobel_x = [[-0.5, 0, 0.5],
#              [-1.0, 0, 1.0],
#              [-0.5, 0, 0.5]]
#   sobel_y = sobel_x.T   (zero middle row)


def canny_kernel(img_ref, out_ref, pad_ref):
    # img_ref: (B, C, H, W) f32 in VMEM
    # out_ref: (B, 1, H, W) f32 in VMEM
    # pad_ref: (B, H+2, W+2) f32 VMEM scratch (zero-padded channel sum)
    B, C, H, W = img_ref.shape

    # Channel sum first (linearity of the conv; matches torch's accumulation
    # of grad_x/grad_y across channels before squaring).
    s = jnp.sum(img_ref[...], axis=1)                        # (B, H, W)

    # Zero-padded copy (padding=1 in the torch Conv2d).  Full-buffer zero is
    # ~2.6 KiB of stores; cheaper and safer to lower than border-only writes.
    pad_ref[...] = jnp.zeros_like(pad_ref)
    pad_ref[:, 1:H + 1, 1:W + 1] = s

    p = lambda di, dj: pad_ref[:, di:di + H, dj:dj + W]
    p00, p01, p02 = p(0, 0), p(0, 1), p(0, 2)
    p10, p12 = p(1, 0), p(1, 2)                              # center tap (1,1) unused
    p20, p21, p22 = p(2, 0), p(2, 1), p(2, 2)

    # Constant-folded, zero-tap-skipped 3x3 cross-correlations.
    #   gx = 0.5*(p02+p22-p00-p20) + (p12-p10)
    #   gy = 0.5*(p20+p22-p00-p02) + (p21-p01)
    a = p22 - p00
    b = p02 - p20
    gx = 0.5 * (a + b) + (p12 - p10)       # sobel_x
    gy = 0.5 * (a - b) + (p21 - p01)       # sobel_y = sobel_x.T

    mag = gx * gx + gy * gy                                  # (B, H, W)

    # Fused normalization: (mag/rng - 0.5) * 2 == mag * (2/rng) - 1.
    # Exact reciprocal (not approx) so the 1e-4 test tolerance holds.
    # NOTE: rng == 0 (constant input) gives inf/NaN, same as the torch module.
    rng = jnp.max(mag) - jnp.min(mag)
    scale = 2.0 / rng
    out_ref[...] = (mag * scale - 1.0).reshape(B, 1, H, W)

    # TODO(synk): grad_orientation / gaussian / directional / hysteresis
    # branches of the module are dead code in forward(); intentionally omitted.


def canny_filter(img):
    img = img.astype(jnp.float32)
    B, C, H, W = img.shape
    # Whole problem fits in VMEM in one shot; a standalone call is
    # launch/overhead-bound, so no grid.
    # TODO(synk): for real image sizes, grid over (B, H-tiles) with a 1-row
    # halo, split normalization into two passes (per-tile max/min + epilogue),
    # pick W tiles that are multiples of 128 (lane-dense vst), mark the
    # batch/H axis "parallel" for v7x's 2 TensorCores, and budget tiles
    # against v7x's 64 MiB VMEM via pltpu.CompilerParams(vmem_limit_bytes=...).
    return pl.pallas_call(
        canny_kernel,
        out_shape=jax.ShapeDtypeStruct((B, 1, H, W), jnp.float32),
        in_specs=[pl.BlockSpec(memory_space=pltpu.MemorySpace.VMEM)],
        out_specs=pl.BlockSpec(memory_space=pltpu.MemorySpace.VMEM),
        scratch_shapes=[pltpu.VMEM((B, H + 2, W + 2), jnp.float32)],
    )(img)


def canny_filter_ref(img):
    # Pure-JAX reference (XLA conv is also cross-correlation, like PyTorch).
    img = img.astype(jnp.float32)
    sobel = get_sobel_kernel_np(3)
    wx = jnp.asarray(sobel).reshape(1, 1, 3, 3)
    wy = jnp.asarray(sobel.T).reshape(1, 1, 3, 3)
    s = jnp.sum(img, axis=1, keepdims=True)
    dn = ("NCHW", "OIHW", "NCHW")
    gx = jax.lax.conv_general_dilated(s, wx, (1, 1), "SAME", dimension_numbers=dn)
    gy = jax.lax.conv_general_dilated(s, wy, (1, 1), "SAME", dimension_numbers=dn)
    mag = gx ** 2 + gy ** 2
    mag = mag / (jnp.max(mag) - jnp.min(mag))
    return (mag - 0.5) * 2.0


if __name__ == "__main__":
    key = jax.random.PRNGKey(0)
    img = jax.random.normal(key, (2, 4, 16, 16), dtype=jnp.float32)

    out = jax.block_until_ready(canny_filter(img))
    ref = jax.block_until_ready(canny_filter_ref(img))

    assert out.shape == (2, 1, 16, 16)
    assert jnp.allclose(out, ref, atol=1e-4, rtol=1e-4), "mismatch vs reference"

    print("KERNEL_OK")
</pallas_src>

<mosaic_0001>
module attributes {stable_mosaic.version = 11 : i64} {
  func.func @canny_kernel(%arg0: memref<2x4x16x16xf32, #tpu.memory_space<vmem>>, %arg1: memref<2x1x16x16xf32, #tpu.memory_space<vmem>>, %arg2: memref<2x18x18xf32, #tpu.memory_space<vmem>>) attributes {dimension_semantics = [], scalar_prefetch = 0 : i64, scratch_operands = 1 : i64, tpu.core_type = #tpu.core_type<tc>} {
    %c0 = arith.constant 0 : index
    %c0_0 = arith.constant 0 : index
    %c0_1 = arith.constant 0 : index
    %c0_2 = arith.constant 0 : index
    %0 = vector.load %arg0[%c0, %c0_0, %c0_1, %c0_2] : memref<2x4x16x16xf32, #tpu.memory_space<vmem>>, vector<2x4x16x16xf32>
    %cst = arith.constant dense<0.000000e+00> : vector<2x16x16xf32>
    %1 = vector.multi_reduction <add>, %0, %cst [1] : vector<2x4x16x16xf32> to vector<2x16x16xf32>
    %cst_3 = arith.constant 0.000000e+00 : f32
    %2 = vector.broadcast %cst_3 : f32 to vector<2x18x18xf32>
    %c0_4 = arith.constant 0 : index
    %c0_5 = arith.constant 0 : index
    %c0_6 = arith.constant 0 : index
    %3 = vector.load %arg2[%c0_4, %c0_5, %c0_6] : memref<2x18x18xf32, #tpu.memory_space<vmem>>, vector<2x18x18xf32>
    tpu.vector_store %arg2[%c0_4, %c0_5, %c0_6], %2 {strides = array<i32>} : memref<2x18x18xf32, #tpu.memory_space<vmem>>, vector<2x18x18xf32>,
    %c0_7 = arith.constant 0 : index
    %c1 = arith.constant 1 : index
    %c1_8 = arith.constant 1 : index
    %4 = vector.load %arg2[%c0_7, %c1, %c1_8] : memref<2x18x18xf32, #tpu.memory_space<vmem>>, vector<2x16x16xf32>
    tpu.vector_store %arg2[%c0_7, %c1, %c1_8], %1 {strides = array<i32>} : memref<2x18x18xf32, #tpu.memory_space<vmem>>, vector<2x16x16xf32>,
    %c0_9 = arith.constant 0 : index
    %c0_10 = arith.constant 0 : index
    %c0_11 = arith.constant 0 : index
    %5 = vector.load %arg2[%c0_9, %c0_10, %c0_11] : memref<2x18x18xf32, #tpu.memory_space<vmem>>, vector<2x16x16xf32>
    %c0_12 = arith.constant 0 : index
    %c0_13 = arith.constant 0 : index
    %c1_14 = arith.constant 1 : index
    %6 = vector.load %arg2[%c0_12, %c0_13, %c1_14] : memref<2x18x18xf32, #tpu.memory_space<vmem>>, vector<2x16x16xf32>
    %c0_15 = arith.constant 0 : index
    %c0_16 = arith.constant 0 : index
    %c2 = arith.constant 2 : index
    %7 = vector.load %arg2[%c0_15, %c0_16, %c2] : memref<2x18x18xf32, #tpu.memory_space<vmem>>, vector<2x16x16xf32>
    %c0_17 = arith.constant 0 : index
    %c1_18 = arith.constant 1 : index
    %c0_19 = arith.constant 0 : index
    %8 = vector.load %arg2[%c0_17, %c1_18, %c0_19] : memref<2x18x18xf32, #tpu.memory_space<vmem>>, vector<2x16x16xf32>
    %c0_20 = arith.constant 0 : index
    %c1_21 = arith.constant 1 : index
    %c2_22 = arith.constant 2 : index
    %9 = vector.load %arg2[%c0_20, %c1_21, %c2_22] : memref<2x18x18xf32, #tpu.memory_space<vmem>>, vector<2x16x16xf32>
    %c0_23 = arith.constant 0 : index
    %c2_24 = arith.constant 2 : index
    %c0_25 = arith.constant 0 : index
    %10 = vector.load %arg2[%c0_23, %c2_24, %c0_25] : memref<2x18x18xf32, #tpu.memory_space<vmem>>, vector<2x16x16xf32>
    %c0_26 = arith.constant 0 : index
    %c2_27 = arith.constant 2 : index
    %c1_28 = arith.constant 1 : index
    %11 = vector.load %arg2[%c0_26, %c2_27, %c1_28] : memref<2x18x18xf32, #tpu.memory_space<vmem>>, vector<2x16x16xf32>
    %c0_29 = arith.constant 0 : index
    %c2_30 = arith.constant 2 : index
    %c2_31 = arith.constant 2 : index
    %12 = vector.load %arg2[%c0_29, %c2_30, %c2_31] : memref<2x18x18xf32, #tpu.memory_space<vmem>>, vector<2x16x16xf32>
    %13 = arith.subf %12, %5 : vector<2x16x16xf32>
    %14 = arith.subf %7, %10 : vector<2x16x16xf32>
    %15 = arith.addf %13, %14 : vector<2x16x16xf32>
    %cst_32 = arith.constant 5.000000e-01 : f32
    %16 = vector.broadcast %cst_32 : f32 to vector<2x16x16xf32>
    %17 = arith.mulf %16, %15 : vector<2x16x16xf32>
    %18 = arith.subf %9, %8 : vector<2x16x16xf32>
    %19 = arith.addf %17, %18 : vector<2x16x16xf32>
    %20 = arith.subf %13, %14 : vector<2x16x16xf32>
    %cst_33 = arith.constant 5.000000e-01 : f32
    %21 = vector.broadcast %cst_33 : f32 to vector<2x16x16xf32>
    %22 = arith.mulf %21, %20 : vector<2x16x16xf32>
    %23 = arith.subf %11, %6 : vector<2x16x16xf32>
    %24 = arith.addf %22, %23 : vector<2x16x16xf32>
    %25 = arith.mulf %19, %19 : vector<2x16x16xf32>
    %26 = arith.mulf %24, %24 : vector<2x16x16xf32>
    %27 = arith.addf %25, %26 : vector<2x16x16xf32>
    %28 = vector.shape_cast %27 : vector<2x16x16xf32> to vector<1x2x16x16xf32>
    %cst_34 = arith.constant dense<0xFF800000> : vector<1xf32>
    %29 = vector.multi_reduction <maximumf>, %28, %cst_34 [1, 2, 3] : vector<1x2x16x16xf32> to vector<1xf32>
    %30 = vector.shape_cast %29 : vector<1xf32> to vector<1x1x1x1xf32>
    %31 = vector.extract %30[0, 0, 0, 0] : f32 from vector<1x1x1x1xf32>
    %32 = vector.shape_cast %27 : vector<2x16x16xf32> to vector<1x2x16x16xf32>
    %cst_35 = arith.constant dense<0x7F800000> : vector<1xf32>
    %33 = vector.multi_reduction <minimumf>, %32, %cst_35 [1, 2, 3] : vector<1x2x16x16xf32> to vector<1xf32>
    %34 = vector.shape_cast %33 : vector<1xf32> to vector<1x1x1x1xf32>
    %35 = vector.extract %34[0, 0, 0, 0] : f32 from vector<1x1x1x1xf32>
    %36 = arith.subf %31, %35 : f32
    %cst_36 = arith.constant 2.000000e+00 : f32
    %37 = arith.divf %cst_36, %36 : f32
    %38 = vector.broadcast %37 : f32 to vector<2x16x16xf32>
    %39 = arith.mulf %27, %38 : vector<2x16x16xf32>
    %cst_37 = arith.constant 1.000000e+00 : f32
    %40 = vector.broadcast %cst_37 : f32 to vector<2x16x16xf32>
    %41 = arith.subf %39, %40 : vector<2x16x16xf32>
    %42 = vector.shape_cast %41 : vector<2x16x16xf32> to vector<2x1x16x16xf32>
    %c0_38 = arith.constant 0 : index
    %c0_39 = arith.constant 0 : index
    %c0_40 = arith.constant 0 : index
    %c0_41 = arith.constant 0 : index
    %43 = vector.load %arg1[%c0_38, %c0_39, %c0_40, %c0_41] : memref<2x1x16x16xf32, #tpu.memory_space<vmem>>, vector<2x1x16x16xf32>
    tpu.vector_store %arg1[%c0_38, %c0_39, %c0_40, %c0_41], %42 {strides = array<i32>} : memref<2x1x16x16xf32, #tpu.memory_space<vmem>>, vector<2x1x16x16xf32>,
    return
  }
}

</mosaic_0001>

<bundles_post_ra>
// kernel: tpu_custom_call.1
= control target key start
LH: loop header
LB: loop body
LE: loop exit
PB: predicated region body
PF: predicated region fallthrough
CT: control target
= control target key end

     0   :  { %6 = vsyncpa [#allocation4], 0  ;;  %s431_s0 = inlined_call_operand.hbm [shape: f32[2,4,16,16], index: 0, kind: input, shape index: {}]   ;;  %s432_s1 = inlined_call_operand.hbm [shape: f32[2,1,16,16], index: 1, kind: output, shape index: {}]  }
   0x1   :  { %7 = vsyncpa [#allocation5], 0  ;;  %s373_s6 = smov [#allocation3]  }
   0x2   :  { %s13_s7 = sshll.u32 %s373_s6, 4  ;;  %s14_s7 = int_to_ptr.vmem [resolvable:$true] %s13_s7 }
   0x3   :  { %s337_s8 = scalar_lea.vmem %s14_s7, 2048  ;;  %p342_p1 = scmp.lt.s32.totalorder %s14_s7, %s14_s7 }
   0x4   :  { %p338_p0 = scmp.ne.s32.totalorder %s14_s7, %s337_s8  ;;  %p343_p2 = scmp.lt.s32.totalorder %s337_s8, %s337_s8 }
   0x6   :  { %p344_p3 = por %p343_p2, %p342_p1 }
   0x8   :  { %p345_p4 = pnand %p344_p3, %p338_p0 }
   0xa   :  { %348 = shalt.err (!%p345_p4)
}
   0xb   :  { %s374_s9 = smov 128   ;;  %s375_s10 = smov 8  }
   0xc   :  { %19 = dma.hbm_to_vmem [thread:$0]  %s431_s0, 2048, %s14_s7, [#allocation4], %s374_s9, %s374_s9, %s375_s10  }
   0xd   :  { %369 = dma.done.wait [#allocation4], 2048  }
   0xe   :  { %370 = vsyncadd [#allocation4], 4294965248  ;;  %vm68_vm0 = vcmask 146432   ;;  %v376_v0 = vmov 0.0   ;;  %vm71_vm1 = vcmask 140288   ;;  %vm39_vm2 = vcmask 130048  }
   0xf   :  { %73 = vst.msk [vmem:[#allocation2 + $0x18] sm:$0xff] %vm68_vm0, %v376_v0  ;;  %74 = vst.msk [vmem:[#allocation2 + $0x20] sm:$0xff] %vm68_vm0, %v376_v0  ;;  %v31_v1 = vld [vmem:[#allocation3 + $0x40] sm:$0xff]  ;;  %v33_v2 = vld [vmem:[#allocation3 + $0x50] sm:$0xff]  ;;  %s377_s0 = smov 1   ;;  %vm92_vm3 = vcmask 138248  }
  0x10   :  { %69 = vst.msk [vmem:[#allocation2] sm:$0xff] %vm68_vm0, %v376_v0  ;;  %70 = vst.msk [vmem:[#allocation2 + $0x8] sm:$0xff] %vm68_vm0, %v376_v0  ;;  %v35_v3 = vld [vmem:[#allocation3 + $0x60] sm:$0xff]  ;;  %v37_v4 = vld [vmem:[#allocation3 + $0x70] sm:$0xff]  ;;  %v54_v5 = vsel %vm39_vm2, %v31_v1, 0.0  ;;  %v55_v6 = vsel %vm39_vm2, %v33_v2, 0.0 }
  0x11   :  { %75 = vst.msk [vmem:[#allocation2 + $0x28] sm:$0x3] %vm71_vm1, %v376_v0  ;;  %72 = vst.msk [vmem:[#allocation2 + $0x10] sm:$0x3] %vm71_vm1, %v376_v0  ;;  %v57_v7 = vsel %vm39_vm2, %v35_v3, 0.0  ;;  %v23_v8 = vld [vmem:[#allocation3] sm:$0xff]  ;;  %v56_v10 = vadd.f32 %v55_v6, %v54_v5 }
  0x12   :  { %v25_v9 = vld [vmem:[#allocation3 + $0x10] sm:$0xff]  ;;  %v27_v11 = vld [vmem:[#allocation3 + $0x20] sm:$0xff]  ;;  %v40_v13 = vsel %vm39_vm2, %v23_v8, 0.0  ;;  %v32_v15 = vld [vmem:[#allocation3 + $0x48] sm:$0xff]  ;;  %v59_v16 = vsel %vm39_vm2, %v37_v4, 0.0  ;;  %s378_s13 = smov 2  }
  0x13   :  { %v29_v12 = vld [vmem:[#allocation3 + $0x30] sm:$0xff]  ;;  %v41_v14 = vsel %vm39_vm2, %v25_v9, 0.0  ;;  %v43_v18 = vsel %vm39_vm2, %v27_v11, 0.0  ;;  %v34_v19 = vld [vmem:[#allocation3 + $0x58] sm:$0xff]  ;;  %v36_v20 = vld [vmem:[#allocation3 + $0x68] sm:$0xff]  ;;  %v61_v22 = vsel %vm39_vm2, %v32_v15, 0.0  ;;  %v58_v23 = vadd.f32 %v57_v7, %v56_v10 }
  0x14   :  { %v42_v17 = vadd.f32 %v41_v14, %v40_v13  ;;  %v38_v21 = vld [vmem:[#allocation3 + $0x78] sm:$0xff]  ;;  %v45_v24 = vsel %vm39_vm2, %v29_v12, 0.0  ;;  %v62_v25 = vsel %vm39_vm2, %v34_v19, 0.0  ;;  %v64_v26 = vsel %vm39_vm2, %v36_v20, 0.0  ;;  %v24_v27 = vld [vmem:[#allocation3 + $0x8] sm:$0xff]  ;;  %s379_s19 = smov 126  }
  0x15   :  { %v26_v28 = vld [vmem:[#allocation3 + $0x18] sm:$0xff]  ;;  %v28_v29 = vld [vmem:[#allocation3 + $0x28] sm:$0xff]  ;;  %v63_v31 = vadd.f32 %v62_v25, %v61_v22  ;;  %v47_v33 = vsel %vm39_vm2, %v24_v27, 0.0  ;;  %v60_v35 = vadd.f32 %v59_v16, %v58_v23  ;;  %v66_v36 = vsel %vm39_vm2, %v38_v21, 0.0  ;;  %s380_s20 = smov [#allocation6]  }
  0x16   :  { %v44_v30 = vadd.f32 %v43_v18, %v42_v17  ;;  %v30_v32 = vld [vmem:[#allocation3 + $0x38] sm:$0xff]  ;;  %v48_v34 = vsel %vm39_vm2, %v26_v28, 0.0  ;;  %v50_v38 = vsel %vm39_vm2, %v28_v29, 0.0  ;;  %vm225_vm4 = vcmask 146448   ;;  %s297_s21 = sshll.u32 %s380_s20, 4  ;;  %s298_s21 = int_to_ptr.vmem [resolvable:$true] %s297_s21 }
  0x17   :  { %v49_v37 = vadd.f32 %v48_v34, %v47_v33  ;;  %v65_v40 = vadd.f32 %v64_v26, %v63_v31  ;;  %v52_v41 = vsel %vm39_vm2, %v30_v32, 0.0  ;;  %84 = vrot.lane.b32.xlu1 %v60_v35, %s377_s0  ;;  %s349_s22 = scalar_lea.vmem %s298_s21, 512  ;;  %p354_p6 = scmp.lt.s32.totalorder %s298_s21, %s298_s21 }
  0x18   :  { %v46_v39 = vadd.f32 %v45_v24, %v44_v30  ;;  %p350_p5 = scmp.ne.s32.totalorder %s298_s21, %s349_s22  ;;  %p355_p7 = scmp.lt.s32.totalorder %s349_s22, %s349_s22 }
  0x19   :  { %v51_v42 = vadd.f32 %v50_v38, %v49_v37  ;;  %v67_v43 = vadd.f32 %v66_v36, %v65_v40 }
  0x1a   :  { %80 = vrot.lane.b32.xlu0 %v46_v39, %s377_s0  ;;  %p356_p8 = por %p355_p7, %p354_p6 }
  0x1b   :  { %v53_v44 = vadd.f32 %v52_v41, %v51_v42  ;;  %86 = vrot.lane.b32.xlu1 %v67_v43, %s377_s0 }
  0x1c   :  { %p357_p9 = pnand %p356_p8, %p350_p5 }
  0x1e   :  { %82 = vrot.lane.b32.xlu0 %v53_v44, %s377_s0 }
  0x89   :  { %v85_v45 = vpop.permute.xlu1 %84 }
  0x8a   :  { %95 = vst.msk [vmem:[#allocation2 + $0x19] sm:$0xff] %vm92_vm3, %v85_v45 }
  0x8c   :  { %v81_v46 = vpop.permute.xlu0 %80 }
  0x8d   :  { %93 = vst.msk [vmem:[#allocation2 + $0x1] sm:$0xff] %vm92_vm3, %v81_v46  ;;  %v87_v47 = vpop.permute.xlu1 %86 }
  0x8e   :  { %96 = vst.msk [vmem:[#allocation2 + $0x21] sm:$0xff] %vm92_vm3, %v87_v47 }
  0x90   :  { %v83_v48 = vpop.permute.xlu0 %82 }
  0x91   :  { %94 = vst.msk [vmem:[#allocation2 + $0x9] sm:$0xff] %vm92_vm3, %v83_v48  ;;  %v99_v50 = vld [vmem:[#allocation2 + $0x18] sm:$0xff] }
  0x92   :  { %v103_v58 = vld [vmem:[#allocation2 + $0x19] sm:$0xff] }
  0x94   :  { %v97_v49 = vld [vmem:[#allocation2] sm:$0xff] }
  0x95   :  { %113 = vrot.lane.b32.xlu0 %v97_v49, %s378_s13  ;;  %v100_v53 = vld [vmem:[#allocation2 + $0x20] sm:$0xff] }
  0x96   :  { %v107_v54 = vld [vmem:[#allocation2 + $0x1a] sm:$0xff]  ;;  %v108_v57 = vld [vmem:[#allocation2 + $0x22] sm:$0xff] }
  0x97   :  { %v101_v56 = vld [vmem:[#allocation2 + $0x1] sm:$0xff]  ;;  %v191_v62 = vsub.f32 %v107_v54, %v99_v50  ;;  %v192_v0 = vsub.f32 %v108_v57, %v100_v53 }
  0x98   :  { %v98_v51 = vld [vmem:[#allocation2 + $0x8] sm:$0xff] }
  0x99   :  { %117 = vrot.lane.b32.xlu0 %v99_v50, %s378_s13  ;;  %115 = vrot.lane.b32.xlu1 %v98_v51, %s378_s13  ;;  %v105_v52 = vld [vmem:[#allocation2 + $0x2] sm:$0xff]  ;;  %v106_v55 = vld [vmem:[#allocation2 + $0xa] sm:$0xff] }
  0x9a   :  { %v102_v59 = vld [vmem:[#allocation2 + $0x9] sm:$0xff]  ;;  %v189_v60 = vsub.f32 %v105_v52, %v97_v49  ;;  %v104_v61 = vld [vmem:[#allocation2 + $0x21] sm:$0xff]  ;;  %v190_v63 = vsub.f32 %v106_v55, %v98_v51 }
  0x9d   :  { %133 = vrot.lane.b32.xlu0 %v105_v52, %s378_s13  ;;  %119 = vrot.lane.b32.xlu1 %v100_v53, %s378_s13 }
  0xa1   :  { %137 = vrot.lane.b32.xlu0 %v107_v54, %s378_s13  ;;  %135 = vrot.lane.b32.xlu1 %v106_v55, %s378_s13 }
  0xa5   :  { %161 = vrot.lane.b32.xlu0 %v101_v56, %s378_s13  ;;  %139 = vrot.lane.b32.xlu1 %v108_v57, %s378_s13 }
  0xa9   :  { %165 = vrot.lane.b32.xlu0 %v103_v58, %s378_s13  ;;  %163 = vrot.lane.b32.xlu1 %v102_v59, %s378_s13 }
  0xad   :  { %197 = vrot.lane.b32.xlu0 %v189_v60, %s377_s0  ;;  %167 = vrot.lane.b32.xlu1 %v104_v61, %s378_s13 }
  0xb1   :  { %201 = vrot.lane.b32.xlu0 %v191_v62, %s377_s0  ;;  %199 = vrot.lane.b32.xlu1 %v190_v63, %s377_s0 }
  0xb5   :  { %203 = vrot.lane.b32.xlu1 %v192_v0, %s377_s0 }
 0x107   :  { %v114_v1 = vpop.permute.xlu0 %113 }
 0x108   :  { %v125_v12 = vsub.f32 %v105_v52, %v114_v1 }
 0x10b   :  { %v116_v2 = vpop.permute.xlu1 %115  ;;  %v118_v3 = vpop.permute.xlu0 %117 }
 0x10c   :  { %v126_v14 = vsub.f32 %v106_v55, %v116_v2  ;;  %v127_v15 = vsub.f32 %v107_v54, %v118_v3 }
 0x10f   :  { %v120_v4 = vpop.permute.xlu1 %119  ;;  %v134_v5 = vpop.permute.xlu0 %133 }
 0x110   :  { %v145_v8 = vsub.f32 %v97_v49, %v134_v5  ;;  %v128_v23 = vsub.f32 %v108_v57, %v120_v4 }
 0x112   :  { %v181_v16 = vsub.f32 %v125_v12, %v145_v8  ;;  %v149_v21 = vadd.f32 %v145_v8, %v125_v12 }
 0x113   :  { %v136_v6 = vpop.permute.xlu1 %135  ;;  %v138_v7 = vpop.permute.xlu0 %137 }
 0x114   :  { %v146_v11 = vsub.f32 %v98_v51, %v136_v6  ;;  %v147_v13 = vsub.f32 %v99_v50, %v138_v7  ;;  %v185_v29 = vmul.f32 0.5, %v181_v16  ;;  %v153_v34 = vmul.f32 0.5, %v149_v21 }
 0x116   :  { %v150_v19 = vadd.f32 %v146_v11, %v126_v14  ;;  %v151_v22 = vadd.f32 %v147_v13, %v127_v15  ;;  %v182_v24 = vsub.f32 %v126_v14, %v146_v11  ;;  %v183_v25 = vsub.f32 %v127_v15, %v147_v13 }
 0x117   :  { %v140_v9 = vpop.permute.xlu1 %139  ;;  %v162_v10 = vpop.permute.xlu0 %161 }
 0x118   :  { %v148_v20 = vsub.f32 %v100_v53, %v140_v9  ;;  %v173_v27 = vsub.f32 %v101_v56, %v162_v10  ;;  %v154_v31 = vmul.f32 0.5, %v150_v19  ;;  %v155_v35 = vmul.f32 0.5, %v151_v22 }
 0x119   :  { %v186_v40 = vmul.f32 0.5, %v182_v24  ;;  %v187_v41 = vmul.f32 0.5, %v183_v25 }
 0x11a   :  { %v152_v32 = vadd.f32 %v148_v20, %v128_v23  ;;  %v184_v36 = vsub.f32 %v128_v23, %v148_v20  ;;  %v177_v42 = vadd.f32 %v173_v27, %v153_v34 }
 0x11b   :  { %v164_v17 = vpop.permute.xlu1 %163  ;;  %v166_v18 = vpop.permute.xlu0 %165 }
 0x11c   :  { %v174_v26 = vsub.f32 %v102_v59, %v164_v17  ;;  %v175_v33 = vsub.f32 %v103_v58, %v166_v18  ;;  %v156_v45 = vmul.f32 0.5, %v152_v32  ;;  %v188_v50 = vmul.f32 0.5, %v184_v36 }
 0x11d   :  { %v213_v55 = vmul.f32 %v177_v42, %v177_v42 }
 0x11e   :  { %v178_v38 = vadd.f32 %v174_v26, %v154_v31  ;;  %v179_v46 = vadd.f32 %v175_v33, %v155_v35 }
 0x11f   :  { %v168_v28 = vpop.permute.xlu1 %167  ;;  %v198_v30 = vpop.permute.xlu0 %197 }
 0x120   :  { %v209_v37 = vadd.f32 %v198_v30, %v185_v29  ;;  %v176_v39 = vsub.f32 %v104_v61, %v168_v28  ;;  %v214_v51 = vmul.f32 %v178_v38, %v178_v38  ;;  %v215_v57 = vmul.f32 %v179_v46, %v179_v46 }
 0x122   :  { %v217_v49 = vmul.f32 %v209_v37, %v209_v37  ;;  %v180_v52 = vadd.f32 %v176_v39, %v156_v45 }
 0x123   :  { %v200_v43 = vpop.permute.xlu1 %199  ;;  %v202_v44 = vpop.permute.xlu0 %201 }
 0x124   :  { %v210_v47 = vadd.f32 %v200_v43, %v186_v40  ;;  %v211_v48 = vadd.f32 %v202_v44, %v187_v41  ;;  %v221_v60 = vadd.f32 %v217_v49, %v213_v55  ;;  %v216_v61 = vmul.f32 %v180_v52, %v180_v52 }
 0x126   :  { %v218_v53 = vmul.f32 %v210_v47, %v210_v47  ;;  %v219_v54 = vmul.f32 %v211_v48, %v211_v48  ;;  %v242_v3 = vsel %vm225_vm4, %v221_v60, inf  ;;  %v226_v4 = vsel %vm225_vm4, %v221_v60, -inf }
 0x127   :  { %v204_v56 = vpop.permute.xlu1 %203 }
 0x128   :  { %v222_v58 = vadd.f32 %v218_v53, %v214_v51  ;;  %v212_v59 = vadd.f32 %v204_v56, %v188_v50  ;;  %v223_v62 = vadd.f32 %v219_v54, %v215_v57 }
 0x12a   :  { %v220_v63 = vmul.f32 %v212_v59, %v212_v59  ;;  %v243_v1 = vsel %vm225_vm4, %v222_v58, inf  ;;  %v227_v2 = vsel %vm225_vm4, %v222_v58, -inf  ;;  %v244_v5 = vsel %vm225_vm4, %v223_v62, inf }
 0x12b   :  { %v228_v7 = vsel %vm225_vm4, %v223_v62, -inf  ;;  %v246_v9 = vmin.f32 %v242_v3, %v243_v1  ;;  %v230_v11 = vmax.f32 %v226_v4, %v227_v2 }
 0x12c   :  { %v224_v0 = vadd.f32 %v220_v63, %v216_v61 }
 0x12e   :  { %v245_v6 = vsel %vm225_vm4, %v224_v0, inf  ;;  %v229_v8 = vsel %vm225_vm4, %v224_v0, -inf }
 0x12f   :  { %v247_v10 = vmin.f32 %v244_v5, %v245_v6  ;;  %v231_v12 = vmax.f32 %v228_v7, %v229_v8 }
 0x131   :  { %v248_v13 = vmin.f32 %v246_v9, %v247_v10  ;;  %v232_v14 = vmax.f32 %v230_v11, %v231_v12 }
 0x133   :  { %249 = vmin.xlane.f32.xlu1 %v248_v13  ;;  %233 = vmax.xlane.f32.xlu0 %v232_v14 }
 0x1bc   :  { %v250_v15 = vpop.xlane.xlu1 %249  ;;  %v234_v16 = vpop.xlane.xlu0 %233 }
 0x1bd   :  { %v251_v17 = vrot.slane %v250_v15, 4  ;;  %v235_v18 = vrot.slane %v234_v16, 4 }
 0x1bf   :  { %v252_v19 = vmin.f32 %v250_v15, %v251_v17  ;;  %v236_v20 = vmax.f32 %v234_v16, %v235_v18 }
 0x1c1   :  { %v253_v21 = vrot.slane %v252_v19, 2  ;;  %v237_v22 = vrot.slane %v236_v20, 2 }
 0x1c3   :  { %v238_v23 = vmax.f32 %v236_v20, %v237_v22  ;;  %v254_v24 = vmin.f32 %v252_v19, %v253_v21 }
 0x1c5   :  { %v239_v25 = vrot.slane %v238_v23, 1  ;;  %v255_v26 = vrot.slane %v254_v24, 1 }
 0x1c7   :  { %v240_v27 = vmax.f32 %v238_v23, %v239_v25  ;;  %v256_v28 = vmin.f32 %v254_v24, %v255_v26 }
 0x1c9   :  { %313 = vpush %v240_v27 }
 0x1ca   :  { %315 = vpush %v256_v28 }
 0x1fa   :  { %s314_s14 = spop %313 }
 0x1fb   :  { %s316_s15 = spop %315 }
 0x1fc   :  { %s258_s16 = ssub.f32 %s314_s14, %s316_s15 }
 0x1fe   :  { %v259_v29 = vstv %s258_s16 }
 0x1ff   :  { %327 = vrcp.f32 %v259_v29 }
 0x20c   :  { %v328_v30 = vpop.eup %327 }
 0x20d   :  { %317 = vpush %v328_v30 }
 0x23e   :  { %s318_s17 = spop %317 }
 0x23f   :  { %s262_s18 = smul.f32 2.0, %s318_s17 }
 0x241   :  { %v263_v31 = vstv %s262_s18 }
 0x242   :  { %v264_v32 = vmul.f32 %v263_v31, %v221_v60  ;;  %v265_v33 = vmul.f32 %v263_v31, %v222_v58  ;;  %v266_v34 = vmul.f32 %v263_v31, %v223_v62  ;;  %v267_v35 = vmul.f32 %v263_v31, %v224_v0 }
 0x244   :  { %v310_v36 = vadd.f32 -1.0, %v265_v33  ;;  %v309_v37 = vadd.f32 -1.0, %v264_v32  ;;  %v312_v38 = vadd.f32 -1.0, %v267_v35  ;;  %v311_v39 = vadd.f32 -1.0, %v266_v34 }
 0x246   :  { %278 = vrot.lane.b32.xlu1 %v310_v36, %s379_s19  ;;  %276 = vrot.lane.b32.xlu0 %v309_v37, %s379_s19 }
 0x24a   :  { %282 = vrot.lane.b32.xlu1 %v312_v38, %s379_s19  ;;  %280 = vrot.lane.b32.xlu0 %v311_v39, %s379_s19 }
 0x2b8   :  { %v279_v40 = vpop.permute.xlu1 %278  ;;  %v277_v41 = vpop.permute.xlu0 %276 }
 0x2b9   :  { %289 = vst.msk [vmem:[#allocation6 + $0x8] sm:$0xff] %vm39_vm2, %v279_v40  ;;  %288 = vst.msk [vmem:[#allocation6] sm:$0xff] %vm39_vm2, %v277_v41 }
 0x2bc   :  { %v283_v42 = vpop.permute.xlu1 %282  ;;  %v281_v43 = vpop.permute.xlu0 %280 }
 0x2bd   :  { %291 = vst.msk [vmem:[#allocation6 + $0x18] sm:$0xff] %vm39_vm2, %v283_v42  ;;  %290 = vst.msk [vmem:[#allocation6 + $0x10] sm:$0xff] %vm39_vm2, %v281_v43 }
 0x2be   :  { %360 = shalt.err (!%p357_p9)
}
 0x2bf   :  { %303 = dma.vmem_to_hbm [thread:$0]  %s298_s21, 512, %s432_s1, [#allocation5], %s374_s9, %s374_s9, %s375_s10  }
 0x2c0   :  { %371 = dma.done.wait [#allocation5], 512  }
 0x2c1   :  { %372 = vsyncadd [#allocation5], 4294966784 }
 0x2c2   :  { %307 = vsyncpa [#allocation4], 1 }
 0x2c3   :  { %308 = vsyncpa [#allocation5], 1 }

</bundles_post_ra>
